<compile_context>
chip_gen: v7x
topology: tpu7x:2x2x1
jax: 0.10.0
libtpu: 0.0.40
codegen_flags: <defaults>
</compile_context>

<pallas_src>
import functools

import jax
import jax.numpy as jnp
from jax import lax
from jax.experimental import pallas as pl
from jax.experimental.pallas import tpu as pltpu

EPS = 1e-5

VMEM_LIMIT = 32 * 1024 * 1024          # scoped-VMEM request (safe on v5e/v6e/v7x)
FUSED_SLAB_BYTES = 3 * 1024 * 1024     # per-channel-block slab budget (fused path)
TWO_PASS_BLOCK_BYTES = 2 * 1024 * 1024  # per-block target (two-pass path)


def _divisor_multiple(dim, unit, cap):
    """Largest t <= cap with dim % t == 0 and t % unit == 0, else None."""
    best = None
    t = unit
    cap = min(cap, dim)
    while t <= cap:
        if dim % t == 0:
            best = t
        t += unit
    return best


def _choose_fused_tc(n, c, m, itemsize, unit):
    """Channel tile for the fused path, or None if no slab fits the budget."""
    max_tc = FUSED_SLAB_BYTES // max(1, n * m * itemsize)
    if max_tc < 1:
        return None
    cap = min(max_tc, 256)
    # Prefer >= 2 channel blocks (v7x megacore) when C allows it.
    if c >= 2 * unit:
        tc = _divisor_multiple(c, unit, min(cap, c // 2))
        if tc is not None:
            return tc
    tc = _divisor_multiple(c, unit, cap)
    if tc is not None:
        return tc
    if c <= cap:
        return c            # small / odd channel count: full-extent is legal
    return None


# ---------------------------------------------------------------------------
# Fused single-call path: grid over channel blocks only.
# ---------------------------------------------------------------------------
def _fused_kernel(x_ref, g_ref, b_ref, o_ref, *, eps):
    # x_ref/o_ref: (N, TC, M); g_ref/b_ref: (TC, 1) f32.
    x = x_ref[...].astype(jnp.float32)
    count = x.shape[0] * x.shape[2]
    inv_count = 1.0 / float(count)

    s = jnp.sum(x, axis=0)                                    # (TC, M)  VPU adds
    mean = (jnp.sum(s, axis=-1, keepdims=True) * inv_count)[None]   # (1, TC, 1)
    xc = x - mean
    v = jnp.sum(xc * xc, axis=0)                              # (TC, M)
    var = (jnp.sum(v, axis=-1, keepdims=True) * inv_count)[None]    # (1, TC, 1)
    inv = lax.rsqrt(var + eps)                                # EUP slot

    scale = g_ref[...][None] * inv                            # (1, TC, 1)
    shift = b_ref[...][None]
    o_ref[...] = (xc * scale + shift).astype(o_ref.dtype)


# ---------------------------------------------------------------------------
# Two-pass path.
# ---------------------------------------------------------------------------
def _stats_kernel(x_ref, sum_ref, sumsq_ref, acc_ref, accsq_ref):
    # x_ref: (TN, TC, TM); sum_ref/sumsq_ref: (TC, 1) f32 resident outputs;
    # acc_ref/accsq_ref: (TC, TM) f32 elementwise partial accumulators.
    first = (pl.program_id(1) == 0) & (pl.program_id(2) == 0)

    @pl.when(first)
    def _():
        acc_ref[...] = jnp.zeros_like(acc_ref)
        accsq_ref[...] = jnp.zeros_like(accsq_ref)

    x = x_ref[...].astype(jnp.float32)            # (TN, TC, TM)
    # Elementwise accumulation only (VPU); no per-tile cross-lane reduce.
    acc_ref[...] += jnp.sum(x, axis=0)
    accsq_ref[...] += jnp.sum(x * x, axis=0)

    last = ((pl.program_id(1) == pl.num_programs(1) - 1) &
            (pl.program_id(2) == pl.num_programs(2) - 1))

    @pl.when(last)
    def _():
        # One XLU lane-reduce per channel block (amortized over all tiles).
        sum_ref[...] = jnp.sum(acc_ref[...], axis=-1, keepdims=True)
        sumsq_ref[...] = jnp.sum(accsq_ref[...], axis=-1, keepdims=True)


def _norm_kernel(x_ref, sum_ref, sumsq_ref, g_ref, b_ref, o_ref, *, count, eps):
    # x_ref/o_ref: (TN, TC, TM); sum/sumsq/g/b: (TC, 1) f32.
    inv_count = 1.0 / count
    mean = sum_ref[...] * inv_count                                   # (TC, 1)
    var = jnp.maximum(sumsq_ref[...] * inv_count - mean * mean, 0.0)
    inv = lax.rsqrt(var + eps)                                        # EUP slot
    scale = g_ref[...] * inv
    shift = b_ref[...] - mean * scale
    x = x_ref[...].astype(jnp.float32)
    o_ref[...] = (x * scale[None] + shift[None]).astype(o_ref.dtype)


# ---------------------------------------------------------------------------
# Wrapper / dispatch.
# ---------------------------------------------------------------------------
def batchnorm2d(x_nchw, gamma, beta, *, eps=EPS, force_two_pass=False):
    """BatchNorm2d forward (training mode: batch statistics).

    x_nchw: (N, C, H, W); gamma, beta: (C,). Returns (N, C, H, W), same dtype.
    """
    N, C, H, W = x_nchw.shape
    M = H * W
    x3 = x_nchw.reshape(N, C, M)                  # free reshape
    item = jnp.dtype(x_nchw.dtype).itemsize
    unit_c = max(1, 32 // item)                   # sublane packing unit
    g2 = gamma.astype(jnp.float32).reshape(C, 1)
    b2 = beta.astype(jnp.float32).reshape(C, 1)

    # ---- Fused fast path: per-channel-block slab resident in VMEM. ----
    tc_fused = None if force_two_pass else _choose_fused_tc(N, C, M, item, unit_c)
    if tc_fused is not None:
        y3 = pl.pallas_call(
            functools.partial(_fused_kernel, eps=eps),
            out_shape=jax.ShapeDtypeStruct((N, C, M), x_nchw.dtype),
            grid_spec=pltpu.PrefetchScalarGridSpec(
                num_scalar_prefetch=0,
                grid=(C // tc_fused,),
                in_specs=[pl.BlockSpec((N, tc_fused, M), lambda c: (0, c, 0)),
                          pl.BlockSpec((tc_fused, 1), lambda c: (c, 0)),
                          pl.BlockSpec((tc_fused, 1), lambda c: (c, 0))],
                out_specs=pl.BlockSpec((N, tc_fused, M), lambda c: (0, c, 0))),
            compiler_params=pltpu.CompilerParams(
                dimension_semantics=("parallel",),
                vmem_limit_bytes=VMEM_LIMIT),
        )(x3, g2, b2)
        return y3.reshape(N, C, H, W)

    # ---- Two-pass path. ----
    # Channel tile: multiple of the packing unit; prefer >= 2 channel blocks.
    cap_c = 64
    if C >= 2 * unit_c:
        cap_c = min(cap_c, max(unit_c, C // 2))
    TC = (_divisor_multiple(C, unit_c, cap_c)
          or _divisor_multiple(C, unit_c, 64)
          or C)
    # Lane tile: multiple of 128 (or full extent for odd spatial sizes).
    TM = _divisor_multiple(M, 128, 4096) or M
    # Fat batch tile to amortize per-grid-step overhead on small H*W layers.
    TN = 1
    for t in range(1, N + 1):
        if N % t == 0 and t * TC * TM * item <= TWO_PASS_BLOCK_BYTES:
            TN = t
    c_blocks, n_blocks, m_blocks = C // TC, N // TN, M // TM
    # TODO(synk): when H*W < 128 a channel-folding (N, C//g, g*M) layout would
    # avoid masked lane stores in pass 2; the fat-TN block already amortizes it.

    # Pass 1: per-channel sum / sum-of-squares (f32), HBM traffic = 1 read.
    sums, sumsq = pl.pallas_call(
        _stats_kernel,
        out_shape=(jax.ShapeDtypeStruct((C, 1), jnp.float32),
                   jax.ShapeDtypeStruct((C, 1), jnp.float32)),
        grid_spec=pltpu.PrefetchScalarGridSpec(
            num_scalar_prefetch=0,
            grid=(c_blocks, n_blocks, m_blocks),
            in_specs=[pl.BlockSpec((TN, TC, TM), lambda c, n, m: (n, c, m))],
            out_specs=[pl.BlockSpec((TC, 1), lambda c, n, m: (c, 0)),
                       pl.BlockSpec((TC, 1), lambda c, n, m: (c, 0))],
            scratch_shapes=[pltpu.VMEM((TC, TM), jnp.float32),
                            pltpu.VMEM((TC, TM), jnp.float32)]),
        compiler_params=pltpu.CompilerParams(
            dimension_semantics=("parallel", "arbitrary", "arbitrary"),
            vmem_limit_bytes=VMEM_LIMIT),
    )(x3)

    # Pass 2: fully parallel normalize with fused per-channel math.
    y3 = pl.pallas_call(
        functools.partial(_norm_kernel, count=float(N * M), eps=eps),
        out_shape=jax.ShapeDtypeStruct((N, C, M), x_nchw.dtype),
        grid_spec=pltpu.PrefetchScalarGridSpec(
            num_scalar_prefetch=0,
            grid=(n_blocks, c_blocks, m_blocks),
            in_specs=[pl.BlockSpec((TN, TC, TM), lambda n, c, m: (n, c, m)),
                      pl.BlockSpec((TC, 1), lambda n, c, m: (c, 0)),
                      pl.BlockSpec((TC, 1), lambda n, c, m: (c, 0)),
                      pl.BlockSpec((TC, 1), lambda n, c, m: (c, 0)),
                      pl.BlockSpec((TC, 1), lambda n, c, m: (c, 0))],
            out_specs=pl.BlockSpec((TN, TC, TM), lambda n, c, m: (n, c, m))),
        compiler_params=pltpu.CompilerParams(
            dimension_semantics=("parallel", "parallel", "parallel"),
            vmem_limit_bytes=VMEM_LIMIT),
    )(x3, sums, sumsq, g2, b2)

    return y3.reshape(N, C, H, W)


def _reference(x_nchw, gamma, beta):
    xf = x_nchw.astype(jnp.float32)
    mean = jnp.mean(xf, axis=(0, 2, 3), keepdims=True)
    var = jnp.mean((xf - mean) ** 2, axis=(0, 2, 3), keepdims=True)
    g = gamma.reshape(1, -1, 1, 1)
    b = beta.reshape(1, -1, 1, 1)
    return ((xf - mean) * lax.rsqrt(var + EPS) * g + b).astype(x_nchw.dtype)


if __name__ == "__main__":
    key = jax.random.PRNGKey(0)
    kx, kg, kb = jax.random.split(key, 3)

    N, C, H, W = 2, 4, 16, 16
    x = jax.random.normal(kx, (N, C, H, W), dtype=jnp.float32)
    # nn.BatchNorm2d defaults are weight=1, bias=0; perturb so the affine
    # transform is exercised.
    gamma = 1.0 + 0.1 * jax.random.normal(kg, (C,), dtype=jnp.float32)
    beta = 0.1 * jax.random.normal(kb, (C,), dtype=jnp.float32)

    ref = _reference(x, gamma, beta)

    # Fused single-call fast path (what this shape dispatches to).
    out_fused = jax.block_until_ready(batchnorm2d(x, gamma, beta))
    assert out_fused.shape == (N, C, H, W)
    assert jnp.allclose(out_fused, ref, atol=1e-4, rtol=1e-4)

    # Two-pass path (exercised explicitly so both kernels compile and run).
    out_2p = jax.block_until_ready(
        batchnorm2d(x, gamma, beta, force_two_pass=True))
    assert out_2p.shape == (N, C, H, W)
    assert jnp.allclose(out_2p, ref, atol=1e-4, rtol=1e-4)

    print("KERNEL_OK")
</pallas_src>

<mosaic_0001>
module attributes {stable_mosaic.version = 11 : i64} {
  func.func @_fused_kernel(%arg0: i32, %arg1: memref<2x4x256xf32, #tpu.memory_space<vmem>>, %arg2: memref<4x1xf32, #tpu.memory_space<vmem>>, %arg3: memref<4x1xf32, #tpu.memory_space<vmem>>, %arg4: memref<2x4x256xf32, #tpu.memory_space<vmem>>) attributes {dimension_semantics = [#tpu.dimension_semantics<parallel>], iteration_bounds = array<i64: 1>, scalar_prefetch = 0 : i64, scratch_operands = 0 : i64, tpu.core_type = #tpu.core_type<tc>, window_params = [{transform_indices = @transform_0, window_bounds = array<i64: 2, 4, 256>}, {transform_indices = @transform_1, window_bounds = array<i64: 4, 1>}, {transform_indices = @transform_2, window_bounds = array<i64: 4, 1>}, {transform_indices = @transform_3, window_bounds = array<i64: 2, 4, 256>}]} {
    %c0 = arith.constant 0 : index
    %c0_0 = arith.constant 0 : index
    %c0_1 = arith.constant 0 : index
    %0 = vector.load %arg1[%c0, %c0_0, %c0_1] : memref<2x4x256xf32, #tpu.memory_space<vmem>>, vector<2x4x256xf32>
    %cst = arith.constant dense<0.000000e+00> : vector<4x256xf32>
    %1 = vector.multi_reduction <add>, %0, %cst [0] : vector<2x4x256xf32> to vector<4x256xf32>
    %cst_2 = arith.constant dense<0.000000e+00> : vector<4xf32>
    %2 = vector.multi_reduction <add>, %1, %cst_2 [1] : vector<4x256xf32> to vector<4xf32>
    %3 = vector.shape_cast %2 : vector<4xf32> to vector<4x1xf32>
    %cst_3 = arith.constant 0.001953125 : f32
    %4 = vector.broadcast %cst_3 : f32 to vector<4x1xf32>
    %5 = arith.mulf %3, %4 : vector<4x1xf32>
    %6 = vector.shape_cast %5 : vector<4x1xf32> to vector<1x4x1xf32>
    %7 = vector.broadcast %6 : vector<1x4x1xf32> to vector<2x4x256xf32>
    %8 = arith.subf %0, %7 : vector<2x4x256xf32>
    %9 = arith.mulf %8, %8 : vector<2x4x256xf32>
    %cst_4 = arith.constant dense<0.000000e+00> : vector<4x256xf32>
    %10 = vector.multi_reduction <add>, %9, %cst_4 [0] : vector<2x4x256xf32> to vector<4x256xf32>
    %cst_5 = arith.constant dense<0.000000e+00> : vector<4xf32>
    %11 = vector.multi_reduction <add>, %10, %cst_5 [1] : vector<4x256xf32> to vector<4xf32>
    %12 = vector.shape_cast %11 : vector<4xf32> to vector<4x1xf32>
    %cst_6 = arith.constant 0.001953125 : f32
    %13 = vector.broadcast %cst_6 : f32 to vector<4x1xf32>
    %14 = arith.mulf %12, %13 : vector<4x1xf32>
    %15 = vector.shape_cast %14 : vector<4x1xf32> to vector<1x4x1xf32>
    %cst_7 = arith.constant 9.99999974E-6 : f32
    %16 = vector.broadcast %cst_7 : f32 to vector<1x4x1xf32>
    %17 = arith.addf %15, %16 : vector<1x4x1xf32>
    %18 = math.rsqrt %17 : vector<1x4x1xf32>
    %c0_8 = arith.constant 0 : index
    %c0_9 = arith.constant 0 : index
    %19 = vector.load %arg2[%c0_8, %c0_9] : memref<4x1xf32, #tpu.memory_space<vmem>>, vector<4x1xf32>
    %20 = vector.shape_cast %19 : vector<4x1xf32> to vector<1x4x1xf32>
    %21 = arith.mulf %20, %18 : vector<1x4x1xf32>
    %c0_10 = arith.constant 0 : index
    %c0_11 = arith.constant 0 : index
    %22 = vector.load %arg3[%c0_10, %c0_11] : memref<4x1xf32, #tpu.memory_space<vmem>>, vector<4x1xf32>
    %23 = vector.shape_cast %22 : vector<4x1xf32> to vector<1x4x1xf32>
    %24 = vector.broadcast %21 : vector<1x4x1xf32> to vector<2x4x256xf32>
    %25 = arith.mulf %8, %24 : vector<2x4x256xf32>
    %26 = vector.broadcast %23 : vector<1x4x1xf32> to vector<2x4x256xf32>
    %27 = arith.addf %25, %26 : vector<2x4x256xf32>
    %c0_12 = arith.constant 0 : index
    %c0_13 = arith.constant 0 : index
    %c0_14 = arith.constant 0 : index
    %28 = vector.load %arg4[%c0_12, %c0_13, %c0_14] : memref<2x4x256xf32, #tpu.memory_space<vmem>>, vector<2x4x256xf32>
    tpu.vector_store %arg4[%c0_12, %c0_13, %c0_14], %27 {strides = array<i32>} : memref<2x4x256xf32, #tpu.memory_space<vmem>>, vector<2x4x256xf32>,
    return
  }
  func.func @transform_0(%arg0: i32) -> (i32, i32, i32) {
    %c0_i32 = arith.constant 0 : i32
    %c0_i32_0 = arith.constant 0 : i32
    %c0_i32_1 = arith.constant 0 : i32
    return %c0_i32, %arg0, %c0_i32_0 : i32, i32, i32
  }
  func.func @transform_1(%arg0: i32) -> (i32, i32) {
    %c0_i32 = arith.constant 0 : i32
    %c0_i32_0 = arith.constant 0 : i32
    return %arg0, %c0_i32 : i32, i32
  }
  func.func @transform_2(%arg0: i32) -> (i32, i32) {
    %c0_i32 = arith.constant 0 : i32
    %c0_i32_0 = arith.constant 0 : i32
    return %arg0, %c0_i32 : i32, i32
  }
  func.func @transform_3(%arg0: i32) -> (i32, i32, i32) {
    %c0_i32 = arith.constant 0 : i32
    %c0_i32_0 = arith.constant 0 : i32
    %c0_i32_1 = arith.constant 0 : i32
    return %c0_i32, %arg0, %c0_i32_0 : i32, i32, i32
  }
}

</mosaic_0001>

<bundles_post_ra>
// kernel: tpu_custom_call.1
= control target key start
LH: loop header
LB: loop body
LE: loop exit
PB: predicated region body
PF: predicated region fallthrough
CT: control target
= control target key end

     0   :  { %8 = vsyncpa [#allocation3], 0  ;;  %s267_s0 = inlined_call_operand.hbm [shape: f32[2,4,256], index: 0, kind: input, shape index: {}]   ;;  %s268_s1 = inlined_call_operand.vmem [shape: f32[4,1], index: 1, kind: input, shape index: {}]   ;;  %s269_s2 = inlined_call_operand.vmem [shape: f32[4,1], index: 2, kind: input, shape index: {}]   ;;  %s270_s3 = inlined_call_operand.hbm [shape: f32[2,4,256], index: 3, kind: output, shape index: {}]  }
   0x1   :  { %9 = vsyncpa [#allocation4], 0  ;;  %s193_s12 = smov [#allocation2]   ;;  %s145_s16 = scalar_lea.hbm %s267_s0, 256 }
   0x2   :  { %s15_s13 = sshll.u32 %s193_s12, 4  ;;  %p146_p0 = scmp.ne.s32.totalorder %s267_s0, %s145_s16  ;;  %s16_s13 = int_to_ptr.vmem [resolvable:$true] %s15_s13 }
   0x3   :  { %p149_p1 = scmp.lt.u32.totalorder %s145_s16, %s267_s0 }
   0x5   :  { %p151_p2 = pnand %p149_p1, %p146_p0 }
   0x7   :  { %154 = shalt.err (!%p151_p2)
}
   0x8   :  { %s155_s21 = scalar_lea.vmem %s16_s13, 256  ;;  %p160_p4 = scmp.lt.s32.totalorder %s16_s13, %s16_s13 }
   0x9   :  { %p156_p3 = scmp.ne.s32.totalorder %s16_s13, %s155_s21  ;;  %p161_p5 = scmp.lt.s32.totalorder %s155_s21, %s155_s21 }
   0xb   :  { %p162_p6 = por %p161_p5, %p160_p4 }
   0xd   :  { %p163_p7 = pnand %p162_p6, %p156_p3 }
   0xf   :  { %166 = shalt.err (!%p163_p7)
}
  0x10   :  { %s194_s22 = smov 128   ;;  %s195_s23 = smov 8  }
  0x11   :  { %21 = dma.hbm_to_vmem [thread:$0]  %s267_s0, 256, %s16_s13, [#allocation3], %s194_s22, %s194_s22, %s195_s23  }
  0x12   :  { %189 = dma.done.wait [#allocation3], 256  }
  0x13   :  { %190 = vsyncadd [#allocation3], 4294967040  ;;  %vm37_vm0 = vcmask 1043456   ;;  %v29_v0 = vld [vmem:[#allocation2] sm:$0xff]  ;;  %v30_v1 = vld [vmem:[#allocation2 + $0x8] sm:$0xff]  ;;  %v54_v15 = vlaneseq  ;;  %v197_v37 = vmov 0  }
  0x14   :  { %v33_v2 = vcombine.high %v29_v0, %v29_v0  ;;  %v34_v3 = vcombine.high %v30_v1, %v30_v1  ;;  %v38_v4 = vsel %vm37_vm0, %v29_v0, 0.0  ;;  %v39_v5 = vsel %vm37_vm0, %v30_v1, 0.0  ;;  %139 = vset.pattern.permute.xlu1 %v197_v37  ;;  %140 = vset.pattern.permute.xlu0 %v197_v37  ;;  %v83_v41 = vld [vmem:[%s268_s1] sm:$0xf]  ;;  %s198_s29 = smov [#allocation5]  }
  0x15   :  { %v40_v6 = vadd.f32 %v39_v5, %v38_v4  ;;  %v196_v13 = vmov 839922192   ;;  %v55_v17 = vshrl.u32 %v54_v15, 7  ;;  %v85_v44 = vld [vmem:[%s269_s2] sm:$0xf]  ;;  %s121_s30 = sshll.u32 %s198_s29, 4  ;;  %s122_s30 = int_to_ptr.vmem [resolvable:$true] %s121_s30 }
  0x16   :  { %v41_v7 = vsel %vm37_vm0, %v33_v2, 0.0  ;;  %v42_v8 = vsel %vm37_vm0, %v34_v3, 0.0  ;;  %v52_v14 = vunpack.c.l.s4 %v196_v13  ;;  %s167_s1 = scalar_lea.vmem %s122_s30, 256  ;;  %p172_p9 = scmp.lt.s32.totalorder %s122_s30, %s122_s30 }
  0x17   :  { %v43_v9 = vadd.f32 %v42_v8, %v41_v7  ;;  %v44_v10 = vsel %vm37_vm0, %v40_v6, 0.0  ;;  %p168_p8 = scmp.ne.s32.totalorder %s122_s30, %s167_s1  ;;  %p173_p10 = scmp.lt.s32.totalorder %s167_s1, %s167_s1 }
  0x18   :  { %v53_v16 = vunpack.c.0.s8 %v52_v14 }
  0x19   :  { %v45_v11 = vsel %vm37_vm0, %v43_v9, 0.0  ;;  %p174_p11 = por %p173_p10, %p172_p9 }
  0x1a   :  { %v46_v12 = vadd.f32 %v45_v11, %v44_v10  ;;  %v56_v18 = vsub.s32 %v53_v16, %v55_v17 }
  0x1b   :  { %p175_p12 = pnand %p174_p11, %p168_p8 }
  0x1c   :  { %47 = vadd.xlane.f32.xlu0 %v46_v12 }
  0xa9   :  { %v48_v19 = vpop.xlane.xlu0 %47 }
  0xaa   :  { %v49_v20 = vmul.f32 0.001953125, %v48_v19 }
  0xac   :  { %v57_v21 = vrot.slane %v49_v20, %v56_v18 }
  0xae   :  { %v59_v22 = vsub.f32 %v29_v0, %v57_v21  ;;  %v60_v23 = vsub.f32 %v30_v1, %v57_v21 }
  0xb0   :  { %v61_v24 = vmul.f32 %v59_v22, %v59_v22  ;;  %v62_v25 = vmul.f32 %v60_v23, %v60_v23 }
  0xb2   :  { %v65_v26 = vcombine.high %v61_v24, %v61_v24  ;;  %v66_v27 = vcombine.high %v62_v25, %v62_v25  ;;  %v69_v28 = vsel %vm37_vm0, %v61_v24, 0.0  ;;  %v70_v29 = vsel %vm37_vm0, %v62_v25, 0.0 }
  0xb3   :  { %v71_v30 = vadd.f32 %v70_v29, %v69_v28 }
  0xb4   :  { %v72_v31 = vsel %vm37_vm0, %v65_v26, 0.0  ;;  %v73_v32 = vsel %vm37_vm0, %v66_v27, 0.0 }
  0xb5   :  { %v74_v33 = vadd.f32 %v73_v32, %v72_v31  ;;  %v75_v34 = vsel %vm37_vm0, %v71_v30, 0.0 }
  0xb7   :  { %v76_v35 = vsel %vm37_vm0, %v74_v33, 0.0 }
  0xb8   :  { %v77_v36 = vadd.f32 %v76_v35, %v75_v34 }
  0xba   :  { %78 = vadd.xlane.f32.xlu0 %v77_v36 }
 0x147   :  { %v79_v38 = vpop.xlane.xlu0 %78 }
 0x148   :  { %v80_v39 = vmul.f32 0.001953125, %v79_v38 }
 0x14a   :  { %v81_v40 = vadd.f32 1e-05, %v80_v39 }
 0x14c   :  { %143 = vrsqrt.f32 %v81_v40 }
 0x156   :  { %v144_v42 = vpop.eup %143 }
 0x157   :  { %v84_v43 = vmul.f32 %v144_v42, %v83_v41 }
 0x159   :  { %88 = vperm.xlu1 %139, %v84_v43  }
 0x15d   :  { %102 = vperm.xlu1 %139, %v85_v44  }
 0x1d8   :  { %v89_v45 = vpop.permute.xlu1 %88 }
 0x1d9   :  { %v96_v46 = vrot.slane %v89_v45, %v56_v18 }
 0x1db   :  { %v98_v48 = vmul.f32 %v96_v46, %v59_v22  ;;  %v99_v49 = vmul.f32 %v96_v46, %v60_v23 }
 0x1dc   :  { %v103_v47 = vpop.permute.xlu1 %102 }
 0x1dd   :  { %v110_v50 = vrot.slane %v103_v47, %v56_v18 }
 0x1df   :  { %v112_v51 = vadd.f32 %v110_v50, %v98_v48  ;;  %v113_v52 = vadd.f32 %v110_v50, %v99_v49 }
 0x1e1   :  { %114 = vst [vmem:[#allocation5] sm:$0xff] %v112_v51  ;;  %115 = vst [vmem:[#allocation5 + $0x8] sm:$0xff] %v113_v52 }
 0x1e2   :  { %178 = shalt.err (!%p175_p12)
}
 0x1e3   :  { %s179_s5 = scalar_lea.hbm %s270_s3, 256 }
 0x1e4   :  { %p180_p13 = scmp.ne.s32.totalorder %s270_s3, %s179_s5  ;;  %p183_p0 = scmp.lt.u32.totalorder %s179_s5, %s270_s3 }
 0x1e6   :  { %p185_p1 = pnand %p183_p0, %p180_p13 }
 0x1e8   :  { %188 = shalt.err (!%p185_p1)
}
 0x1e9   :  { %127 = dma.vmem_to_hbm [thread:$0]  %s122_s30, 256, %s270_s3, [#allocation4], %s194_s22, %s194_s22, %s195_s23  }
 0x1ea   :  { %191 = dma.done.wait [#allocation4], 256  }
 0x1eb   :  { %192 = vsyncadd [#allocation4], 4294967040 }
 0x1ec   :  { %131 = vsyncpa [#allocation3], 1 }
 0x1ed   :  { %132 = vsyncpa [#allocation4], 1 }

</bundles_post_ra>
